<compile_context>
chip_gen: v6e
topology: v6e:2x2x1
jax: 0.10.0
libtpu: 0.0.40
codegen_flags: <defaults>
</compile_context>

<pallas_src>
import jax
import jax.numpy as jnp
from jax.experimental import pallas as pl
from jax.experimental.pallas import tpu as pltpu

_SUBLANE = 8
_LANE = 128
_TARGET_TILE_BYTES = 4 * 1024 * 1024  # ~4 MiB input block per grid step


def _cdiv(a: int, b: int) -> int:
    return -(-a // b)


def _round_up(n: int, m: int) -> int:
    return _cdiv(n, m) * m


def _pythagoras_kernel(x_ref, p_ref, o_ref):
    # x_ref: (tile_rows, 128*feat) interleaved legs (lane-dense).
    # p_ref: (128*feat, 128) constant 0/1 pairing matrix (bf16).
    # o_ref: (tile_rows, 128) hypotenuses (lane-dense, all sublanes used).
    x = x_ref[...].astype(jnp.float32)
    x2 = x * x                                          # VPU, exact f32
    # Pair-sum + lane compaction on the otherwise-idle MXU.  Split x2 into
    # bf16 hi/lo parts (hi + lo == x2 to ~2^-18 relative) so both matmuls run
    # on the native bf16 x bf16 -> f32 accumulate path and the result is
    # f32-accurate independent of any default matmul precision demotion.
    hi = x2.astype(jnp.bfloat16)
    lo = (x2 - hi.astype(jnp.float32)).astype(jnp.bfloat16)
    p = p_ref[...]
    ss = (jnp.dot(hi, p, preferred_element_type=jnp.float32)
          + jnp.dot(lo, p, preferred_element_type=jnp.float32))
    o_ref[...] = jnp.sqrt(ss).astype(o_ref.dtype)       # EUP; dense unmasked stores


@jax.jit
def lambda_pythagoras(x: jax.Array) -> jax.Array:
    """func(x) = sqrt(sum(x**2, axis=-1, keepdims=True)) via a Pallas TPU kernel.

    x: (batch, feat) array (feat = 2 for the pythagoras dataset). Returns (batch, 1).
    """
    batch, feat = x.shape
    lanes_in = _LANE * feat
    out_dtype = x.dtype if jnp.issubdtype(x.dtype, jnp.floating) else jnp.float32

    # ---- tiling over 128-wide lane-dense output rows --------------------------
    rows = max(_SUBLANE, _round_up(_cdiv(batch, _LANE), _SUBLANE))
    # Target ~4 MiB of input per grid step; shrink automatically for large feat.
    target_rows = max(_SUBLANE,
                      (_TARGET_TILE_BYTES // (lanes_in * 4)) // _SUBLANE * _SUBLANE)
    num_tiles = _cdiv(rows, target_rows)
    if num_tiles == 1 and rows >= 2 * _SUBLANE:
        num_tiles = 2                                  # let both v7x TCs work
    tile_rows = _round_up(_cdiv(rows, num_tiles), _SUBLANE)
    rows_pad = num_tiles * tile_rows                   # <= rows + 8*num_tiles
    padded_batch = rows_pad * _LANE

    # ---- layout plumbing: pad only to slab granularity, free reshape ----------
    if padded_batch != batch:
        x = jnp.pad(x, ((0, padded_batch - batch), (0, 0)))   # sqrt(0) = 0, sliced off
    x_slab = x.reshape(rows_pad, lanes_in)             # contiguous view, no copy

    # Constant 0/1 pairing matrix: P[i, j] = 1 iff interleaved lane i belongs to
    # output group j (i // feat == j).  0/1 are exact in bf16.
    pair = ((jnp.arange(lanes_in)[:, None] // feat)
            == jnp.arange(_LANE)[None, :]).astype(jnp.bfloat16)

    cost = pl.CostEstimate(
        flops=rows_pad * _LANE * feat + 4 * rows_pad * _LANE * lanes_in,
        transcendentals=rows_pad * _LANE,
        bytes_accessed=(x_slab.size * x_slab.dtype.itemsize
                        + pair.size * 2
                        + rows_pad * _LANE * jnp.dtype(out_dtype).itemsize),
    )

    out_slab = pl.pallas_call(
        _pythagoras_kernel,
        out_shape=jax.ShapeDtypeStruct((rows_pad, _LANE), out_dtype),
        grid_spec=pl.GridSpec(
            grid=(num_tiles,),
            in_specs=[
                pl.BlockSpec((tile_rows, lanes_in), lambda i: (i, 0)),
                # Same block index every step -> fetched once (DMA elided after).
                pl.BlockSpec((lanes_in, _LANE), lambda i: (0, 0)),
            ],
            out_specs=pl.BlockSpec((tile_rows, _LANE), lambda i: (i, 0)),
        ),
        compiler_params=pltpu.CompilerParams(
            dimension_semantics=("parallel",),
            vmem_limit_bytes=32 * 1024 * 1024,
        ),
        cost_estimate=cost,
    )(x_slab, pair)

    # Dense slab -> (batch, 1): contiguous reshape (free) + tail slice if padded.
    out = out_slab.reshape(padded_batch, 1)
    return out if padded_batch == batch else out[:batch]


if __name__ == "__main__":
    key = jax.random.PRNGKey(0)
    # Small batch of (a, b) leg pairs, consistent with the pythagoras dataset.
    x = jax.random.uniform(key, (8, 2), dtype=jnp.float32, minval=0.0, maxval=10.0)

    out = jax.block_until_ready(lambda_pythagoras(x))
    ref = jnp.sqrt(jnp.sum(x * x, axis=-1, keepdims=True))
    assert out.shape == (8, 1), out.shape
    assert jnp.allclose(out, ref, atol=1e-4, rtol=1e-4), float(jnp.max(jnp.abs(out - ref)))

    # Exercise multiple tiles and non-128-aligned batch padding.
    x_big = jax.random.uniform(key, (5000, 2), dtype=jnp.float32, maxval=5.0)
    out_big = jax.block_until_ready(lambda_pythagoras(x_big))
    ref_big = jnp.sqrt(jnp.sum(x_big * x_big, axis=-1, keepdims=True))
    assert out_big.shape == (5000, 1)
    assert jnp.allclose(out_big, ref_big, atol=1e-4, rtol=1e-4)

    print("KERNEL_OK")
</pallas_src>

<mosaic_0001>
module attributes {stable_mosaic.version = 11 : i64} {
  func.func @_pythagoras_kernel(%arg0: i32, %arg1: memref<8x256xf32, #tpu.memory_space<vmem>>, %arg2: memref<256x128xbf16, #tpu.memory_space<vmem>>, %arg3: memref<8x128xf32, #tpu.memory_space<vmem>>) attributes {dimension_semantics = [#tpu.dimension_semantics<parallel>], iteration_bounds = array<i64: 1>, scalar_prefetch = 0 : i64, scratch_operands = 0 : i64, tpu.core_type = #tpu.core_type<tc>, window_params = [{transform_indices = @transform_0, window_bounds = array<i64: 8, 256>}, {pipeline_mode = #tpu.pipeline_mode<synchronous>, transform_indices = @transform_1, window_bounds = array<i64: 256, 128>}, {transform_indices = @transform_2, window_bounds = array<i64: 8, 128>}]} {
    %c0 = arith.constant 0 : index
    %c0_0 = arith.constant 0 : index
    %0 = vector.load %arg1[%c0, %c0_0] : memref<8x256xf32, #tpu.memory_space<vmem>>, vector<8x256xf32>
    %1 = arith.mulf %0, %0 : vector<8x256xf32>
    %2 = arith.truncf %1 : vector<8x256xf32> to vector<8x256xbf16>
    %3 = arith.extf %2 : vector<8x256xbf16> to vector<8x256xf32>
    %4 = arith.subf %1, %3 : vector<8x256xf32>
    %5 = arith.truncf %4 : vector<8x256xf32> to vector<8x256xbf16>
    %c0_1 = arith.constant 0 : index
    %c0_2 = arith.constant 0 : index
    %6 = vector.load %arg2[%c0_1, %c0_2] : memref<256x128xbf16, #tpu.memory_space<vmem>>, vector<256x128xbf16>
    %cst = arith.constant dense<0.000000e+00> : vector<8x128xf32>
    %7 = tpu.matmul %2, %6, %cst {dimension_numbers = #tpu.dot_dimension_numbers<[1], [0], [0], [1], [0, 0, 1, 1], [], []>} : vector<8x256xbf16>, vector<256x128xbf16>, vector<8x128xf32> -> vector<8x128xf32>
    %cst_3 = arith.constant dense<0.000000e+00> : vector<8x128xf32>
    %8 = tpu.matmul %5, %6, %cst_3 {dimension_numbers = #tpu.dot_dimension_numbers<[1], [0], [0], [1], [0, 0, 1, 1], [], []>} : vector<8x256xbf16>, vector<256x128xbf16>, vector<8x128xf32> -> vector<8x128xf32>
    %9 = arith.addf %7, %8 : vector<8x128xf32>
    %10 = math.sqrt %9 : vector<8x128xf32>
    %c0_4 = arith.constant 0 : index
    %c0_5 = arith.constant 0 : index
    %11 = vector.load %arg3[%c0_4, %c0_5] : memref<8x128xf32, #tpu.memory_space<vmem>>, vector<8x128xf32>
    tpu.vector_store %arg3[%c0_4, %c0_5], %10 {strides = array<i32>} : memref<8x128xf32, #tpu.memory_space<vmem>>, vector<8x128xf32>,
    return
  }
  func.func @transform_0(%arg0: i32) -> (i32, i32) {
    %c0_i32 = arith.constant 0 : i32
    %c0_i32_0 = arith.constant 0 : i32
    return %arg0, %c0_i32 : i32, i32
  }
  func.func @transform_1(%arg0: i32) -> (i32, i32) {
    %c0_i32 = arith.constant 0 : i32
    %c0_i32_0 = arith.constant 0 : i32
    %c0_i32_1 = arith.constant 0 : i32
    return %c0_i32, %c0_i32_0 : i32, i32
  }
  func.func @transform_2(%arg0: i32) -> (i32, i32) {
    %c0_i32 = arith.constant 0 : i32
    %c0_i32_0 = arith.constant 0 : i32
    return %arg0, %c0_i32 : i32, i32
  }
}

</mosaic_0001>

<bundles_post_ra>
// kernel: lambda_pythagoras.1
= control target key start
LH: loop header
LB: loop body
LE: loop exit
PB: predicated region body
PF: predicated region fallthrough
CT: control target
= control target key end

     0   :  { %s394_s1 = inlined_call_operand.vmem [shape: bf16[256,128], index: 1, kind: input, shape index: {}]   ;;  %s395_s0 = inlined_call_operand.vmem [shape: f32[8,256], index: 0, kind: input, shape index: {}]   ;;  %s396_s2 = inlined_call_operand.vmem [shape: f32[8,128], index: 2, kind: output, shape index: {}]  }
   0x1   :  { %v304_v0 = vld [vmem:[%s394_s1 + $0x78] sm:$0xff]   ;;  %v306_v2 = vld [vmem:[%s394_s1 + $0x70] sm:$0xff]   ;;  %v308_v4 = vld [vmem:[%s394_s1 + $0x68] sm:$0xff]  }
   0x2   :  { %v305_v1 = vld [vmem:[%s394_s1 + $0x38] sm:$0xff]   ;;  %260 = vmatprep.subr.bf16.mxu0 %v304_v0  ;;  %282 = vmatprep.subr.bf16.mxu1 %v304_v0  ;;  %v307_v3 = vld [vmem:[%s394_s1 + $0x30] sm:$0xff]   ;;  %v309_v5 = vld [vmem:[%s394_s1 + $0x28] sm:$0xff]  }
   0x3   :  { %261 = vmatpush3.bf16.msra.mxu0 %v305_v1  ;;  %283 = vmatpush3.bf16.msra.mxu1 %v305_v1  ;;  %v310_v6 = vld [vmem:[%s394_s1 + $0x60] sm:$0xff]   ;;  %v312_v8 = vld [vmem:[%s394_s1 + $0x58] sm:$0xff]   ;;  %v314_v10 = vld [vmem:[%s394_s1 + $0x50] sm:$0xff]  }
   0x4   :  { %262 = vmatprep.subr.bf16.mxu0 %v306_v2  ;;  %284 = vmatprep.subr.bf16.mxu1 %v306_v2  ;;  %v311_v7 = vld [vmem:[%s394_s1 + $0x20] sm:$0xff]   ;;  %v313_v9 = vld [vmem:[%s394_s1 + $0x18] sm:$0xff]   ;;  %v13_v12 = vld [vmem:[%s395_s0 + $0x8] sm:$0xff] }
   0x5   :  { %v12_v11 = vld [vmem:[%s395_s0] sm:$0xff]  ;;  %v15_v14 = vmul.f32 %v13_v12, %v13_v12  ;;  %v315_v15 = vld [vmem:[%s394_s1 + $0x10] sm:$0xff]   ;;  %v316_v18 = vld [vmem:[%s394_s1 + $0x48] sm:$0xff]  }
   0x6   :  { %v14_v13 = vmul.f32 %v12_v11, %v12_v11  ;;  %v317_v21 = vld [vmem:[%s394_s1 + $0x8] sm:$0xff]   ;;  %v318_v23 = vld [vmem:[%s394_s1 + $0x40] sm:$0xff]  }
   0x7   :  { %263 = vmatpush3.bf16.msra.mxu0 %v307_v3  ;;  %285 = vmatpush3.bf16.msra.mxu1 %v307_v3  ;;  %v17_v17 = vpack.c.bf16 %v15_v14, %v15_v14  ;;  %v319_v26 = vld [vmem:[%s394_s1] sm:$0xff]  }
   0x8   :  { %264 = vmatprep.subr.bf16.mxu0 %v308_v4  ;;  %286 = vmatprep.subr.bf16.mxu1 %v308_v4  ;;  %v16_v16 = vpack.c.bf16 %v14_v13, %v14_v13 }
   0x9   :  { %v19_v19 = vunpack.c.l.bf16 %v17_v17  ;;  %224 = vmatprep.mubr.bf16.mxu1 %v17_v17 }
   0xa   :  { %v18_v20 = vunpack.c.l.bf16 %v16_v16 }
   0xb   :  { %265 = vmatpush3.bf16.msra.mxu0 %v309_v5  ;;  %287 = vmatpush3.bf16.msra.mxu1 %v309_v5  ;;  %v21_v22 = vsub.f32 %v15_v14, %v19_v19 }
   0xc   :  { %266 = vmatprep.subr.bf16.mxu0 %v310_v6  ;;  %288 = vmatprep.subr.bf16.mxu1 %v310_v6  ;;  %v20_v25 = vsub.f32 %v14_v13, %v18_v20 }
   0xd   :  { %v23_v24 = vpack.c.bf16 %v21_v22, %v21_v22 }
   0xe   :  { %v22_v27 = vpack.c.bf16 %v20_v25, %v20_v25 }
   0xf   :  { %267 = vmatpush3.bf16.msra.mxu0 %v311_v7  ;;  %289 = vmatpush3.bf16.msra.mxu1 %v311_v7 }
  0x10   :  { %268 = vmatprep.subr.bf16.mxu0 %v312_v8  ;;  %290 = vmatprep.subr.bf16.mxu1 %v312_v8 }
  0x11   :  { %184 = vmatprep.mubr.bf16.mxu0 %v23_v24 }
  0x13   :  { %269 = vmatpush3.bf16.msra.mxu0 %v313_v9  ;;  %291 = vmatpush3.bf16.msra.mxu1 %v313_v9 }
  0x14   :  { %270 = vmatprep.subr.bf16.mxu0 %v314_v10  ;;  %292 = vmatprep.subr.bf16.mxu1 %v314_v10 }
  0x17   :  { %271 = vmatpush3.bf16.msra.mxu0 %v315_v15  ;;  %293 = vmatpush3.bf16.msra.mxu1 %v315_v15 }
  0x18   :  { %272 = vmatprep.subr.bf16.mxu0 %v316_v18  ;;  %294 = vmatprep.subr.bf16.mxu1 %v316_v18 }
  0x1b   :  { %273 = vmatpush3.bf16.msra.mxu0 %v317_v21  ;;  %295 = vmatpush3.bf16.msra.mxu1 %v317_v21 }
  0x1c   :  { %274 = vmatprep.subr.bf16.mxu0 %v318_v23  ;;  %296 = vmatprep.subr.bf16.mxu1 %v318_v23 }
  0x1f   :  { %275 = vmatpush3.bf16.msra.mxu0 %v319_v26  ;;  %297 = vmatpush3.bf16.msra.mxu1 %v319_v26 }
  0x22   :  { %185 = vmatmul.mubr.bf16.vlgmr.msra.gmra.mxu0 %v22_v27  ;;  %225 = vmatmul.mubr.bf16.vlgmr.msra.gmra.mxu1 %v16_v16 }
  0xe2   :  { %v276_v28 = vpop.f32.mrf.mxu0  ;;  %v298_v29 = vpop.f32.mrf.mxu1 }
  0xe4   :  { %v277_v30 = vpop.f32.mrf.mxu0  ;;  %v299_v31 = vpop.f32.mrf.mxu1 }
  0xe5   :  { %v278_v32 = vadd.f32 %v277_v30, %v276_v28  ;;  %v300_v33 = vadd.f32 %v299_v31, %v298_v29 }
  0xe6   :  { %v279_v34 = vpop.f32.mrf.mxu0  ;;  %v301_v35 = vpop.f32.mrf.mxu1 }
  0xe7   :  { %v227_v36 = vadd.f32 %v300_v33, %v278_v32 }
  0xe8   :  { %v280_v37 = vpop.f32.mrf.mxu0  ;;  %v302_v38 = vpop.f32.mrf.mxu1 }
  0xe9   :  { %320 = vrsqrt.f32 %v227_v36  ;;  %vm234_vm0 = vcmp.eq.f32.partialorder %v227_v36, inf  ;;  %v237_v41 = vand.u32 2147483648, %v227_v36  ;;  %vm236_vm1 = vcmp.eq.f32.partialorder %v227_v36, 0.0 }
  0xf6   :  { %v321_v39 = vpop.eup %320 }
  0xf7   :  { %v233_v40 = vmul.f32 %v321_v39, %v227_v36 }
  0xf9   :  { %v235_v42 = vsel %vm234_vm0, %v227_v36, %v233_v40 }
  0xfa   :  { %v238_v43 = vsel %vm236_vm1, %v237_v41, %v235_v42 }
  0xfb   :  { %239 = vst [vmem:[%s396_s2] sm:$0xff] %v238_v43 }

</bundles_post_ra>
